<compile_context>
chip_gen: v7x
topology: tpu7x:2x2x1
jax: 0.10.0
libtpu: 0.0.40
codegen_flags: <defaults>
</compile_context>

<pallas_src>
import jax
import jax.numpy as jnp
from jax.experimental import pallas as pl
from jax.experimental.pallas import tpu as pltpu


def down_kernel(x_ref, w1_ref, b1_ref, w2_ref, b2_ref, o_ref, pad1_ref, pad2_ref):
    # x_ref   : (1, 2, 2, h, w*Cin)   pooling parities hoisted to leading dims
    # w1_ref  : (3, w*Cin, w*Cmid)    banded conv1 weights (one matrix per dy)
    # b1_ref  : (1, w*Cmid)
    # w2_ref  : (3, w*Cmid, w*Cout)
    # b2_ref  : (1, w*Cout)
    # o_ref   : (1, h, w*Cout)        lane-dense output slab
    # pad1_ref: (h+2, w*Cin)  VMEM scratch (vertically zero-padded conv1 input)
    # pad2_ref: (h+2, w*Cmid) VMEM scratch (vertically zero-padded conv2 input)
    h = o_ref.shape[1]

    # ---- 2x2 max pool, stride 2 (parities live on the leading block axes) ----
    pooled = jnp.maximum(jnp.maximum(x_ref[0, 0, 0], x_ref[0, 0, 1]),
                         jnp.maximum(x_ref[0, 1, 0], x_ref[0, 1, 1]))  # (h, w*Cin)

    # ---- conv1: vertical zero-pad in scratch + 3 banded matmuls ----
    # Only the two 1-row borders are rewritten each step; the interior is fully
    # overwritten.  No dependence on scratch persistence across grid steps, so
    # the batch grid axis can safely be "parallel" (megacore).
    zero1 = jnp.zeros((1, pad1_ref.shape[1]), jnp.float32)
    pad1_ref[0:1, :] = zero1
    pad1_ref[h + 1:h + 2, :] = zero1
    pad1_ref[1:h + 1, :] = pooled

    acc1 = jnp.zeros((h, w1_ref.shape[2]), jnp.float32)
    for dy in range(3):  # short fixed loop, unrolled at trace time
        acc1 = acc1 + jnp.dot(pad1_ref[dy:dy + h, :], w1_ref[dy],
                              preferred_element_type=jnp.float32)
    y1 = acc1 + b1_ref[...]
    y1 = jnp.maximum(y1, 0.2 * y1)          # LeakyReLU(0.2): one vmul + one vmax

    # ---- conv2: same structure ----
    zero2 = jnp.zeros((1, pad2_ref.shape[1]), jnp.float32)
    pad2_ref[0:1, :] = zero2
    pad2_ref[h + 1:h + 2, :] = zero2
    pad2_ref[1:h + 1, :] = y1

    acc2 = jnp.zeros((h, w2_ref.shape[2]), jnp.float32)
    for dy in range(3):
        acc2 = acc2 + jnp.dot(pad2_ref[dy:dy + h, :], w2_ref[dy],
                              preferred_element_type=jnp.float32)
    y2 = acc2 + b2_ref[...]
    y2 = jnp.maximum(y2, 0.2 * y2)

    o_ref[0, :, :] = y2.astype(o_ref.dtype)  # aligned, lane-dense store


def _banded_rhs(wgt, w):
    """Build banded per-dy weight matrices.

    wgt: (3, 3, Ci, Co) HWIO conv weights.
    Returns B of shape (3, w*Ci, w*Co) with
      B[dy, x*Ci + c, x2*Co + m] = wgt[dy, x - x2 + 1, c, m]  if |x - x2| <= 1
                                   0                          otherwise
    so that (vertically padded activation row-block) @ B[dy], summed over dy,
    equals the padding=1 3x3 convolution (horizontal taps + horizontal zero
    padding are folded into the band structure).
    """
    Ci, Co = wgt.shape[2], wgt.shape[3]
    xs = jnp.arange(w)
    offs = xs[:, None] - xs[None, :] + 1                    # offs[x, x2] = x - x2 + 1
    valid = (offs >= 0) & (offs <= 2)
    blocks = wgt[:, jnp.clip(offs, 0, 2), :, :]             # (3, w, w, Ci, Co)
    blocks = blocks * valid[None, :, :, None, None].astype(wgt.dtype)
    # rows indexed by (x, c), cols by (x2, m)
    return blocks.transpose(0, 1, 3, 2, 4).reshape(3, w * Ci, w * Co)


def down_pallas(x_nchw, w1, b1, w2, b2):
    """x_nchw: (N, Cin, H, W) float32; weights HWIO (3, 3, Cin, Cmid)/(3, 3, Cmid, Cout)."""
    N, Cin, H, W = x_nchw.shape
    h, w = H // 2, W // 2
    Cmid = w1.shape[3]
    Cout = w2.shape[3]

    # Single fused XLA transpose: NCHW -> (N, 2, 2, h, w, Cin), then merge
    # (w, Cin) into the lane axis (free reshape of adjacent dims).
    x6 = x_nchw.reshape(N, Cin, h, 2, w, 2).transpose(0, 3, 5, 2, 4, 1)
    x6 = x6.reshape(N, 2, 2, h, w * Cin)

    # Precompute banded weight matrices and lane-tiled biases (tiny, pure XLA).
    B1 = _banded_rhs(w1, w)                        # (3, w*Cin,  w*Cmid)
    B2 = _banded_rhs(w2, w)                        # (3, w*Cmid, w*Cout)
    b1r = jnp.tile(b1, w).reshape(1, w * Cmid)
    b2r = jnp.tile(b2, w).reshape(1, w * Cout)

    out = pl.pallas_call(
        down_kernel,
        out_shape=jax.ShapeDtypeStruct((N, h, w * Cout), x_nchw.dtype),
        grid_spec=pltpu.PrefetchScalarGridSpec(
            num_scalar_prefetch=0,
            grid=(N,),
            in_specs=[
                pl.BlockSpec((1, 2, 2, h, w * Cin), lambda n: (n, 0, 0, 0, 0)),
                pl.BlockSpec((3, w * Cin, w * Cmid), lambda n: (0, 0, 0)),
                pl.BlockSpec((1, w * Cmid), lambda n: (0, 0)),
                pl.BlockSpec((3, w * Cmid, w * Cout), lambda n: (0, 0, 0)),
                pl.BlockSpec((1, w * Cout), lambda n: (0, 0)),
            ],
            out_specs=pl.BlockSpec((1, h, w * Cout), lambda n: (n, 0, 0)),
            scratch_shapes=[
                pltpu.VMEM((h + 2, w * Cin), jnp.float32),
                pltpu.VMEM((h + 2, w * Cmid), jnp.float32),
            ],
        ),
        compiler_params=pltpu.CompilerParams(
            dimension_semantics=("parallel",)),   # batch is independent (v7x 2 TCs)
    )(x6, B1, b1r, B2, b2r)

    # (N, h, w*Cout) -> (N, Cout, h, w): one XLA transpose on the (small) output.
    return out.reshape(N, h, w, Cout).transpose(0, 3, 1, 2)


def down_reference(x_nchw, w1, b1, w2, b2):
    """Pure-JAX reference matching the PyTorch module (NCHW)."""
    N, C, H, W = x_nchw.shape
    xp = x_nchw.reshape(N, C, H // 2, 2, W // 2, 2).max(axis=(3, 5))

    def conv(x, wgt, b):
        y = jax.lax.conv_general_dilated(
            x, wgt, window_strides=(1, 1), padding=((1, 1), (1, 1)),
            dimension_numbers=("NCHW", "HWIO", "NCHW"),
            precision=jax.lax.Precision.HIGHEST)
        return y + b.reshape(1, -1, 1, 1)

    y = conv(xp, w1, b1)
    y = jnp.where(y >= 0, y, 0.2 * y)
    y = conv(y, w2, b2)
    y = jnp.where(y >= 0, y, 0.2 * y)
    return y


if __name__ == "__main__":
    # Small, deterministic setup: Down(in_channels=4, out_channels=8)
    N, Cin, H, W = 2, 4, 16, 16
    Cmid = Cout = 8

    key = jax.random.PRNGKey(0)
    kx, kw1, kb1, kw2, kb2 = jax.random.split(key, 5)

    x = jax.random.normal(kx, (N, Cin, H, W), dtype=jnp.float32)
    # weights stored HWIO (3, 3, Cin, Cout)
    w1 = jax.random.normal(kw1, (3, 3, Cin, Cmid), dtype=jnp.float32) * 0.1
    b1 = jax.random.normal(kb1, (Cmid,), dtype=jnp.float32) * 0.1
    w2 = jax.random.normal(kw2, (3, 3, Cmid, Cout), dtype=jnp.float32) * 0.1
    b2 = jax.random.normal(kb2, (Cout,), dtype=jnp.float32) * 0.1

    out = jax.jit(down_pallas)(x, w1, b1, w2, b2)
    out = jax.block_until_ready(out)

    ref = down_reference(x, w1, b1, w2, b2)
    assert out.shape == (N, Cout, H // 2, W // 2), out.shape
    err = float(jnp.max(jnp.abs(out - ref)))
    assert jnp.allclose(out, ref, atol=1e-3, rtol=1e-3), err

    print("KERNEL_OK")
</pallas_src>

<mosaic_0001>
module attributes {stable_mosaic.version = 11 : i64} {
  func.func @down_kernel(%arg0: i32, %arg1: memref<1x2x2x8x32xf32, #tpu.memory_space<vmem>>, %arg2: memref<3x32x64xf32, #tpu.memory_space<vmem>>, %arg3: memref<1x64xf32, #tpu.memory_space<vmem>>, %arg4: memref<3x64x64xf32, #tpu.memory_space<vmem>>, %arg5: memref<1x64xf32, #tpu.memory_space<vmem>>, %arg6: memref<1x8x64xf32, #tpu.memory_space<vmem>>, %arg7: memref<10x32xf32, #tpu.memory_space<vmem>>, %arg8: memref<10x64xf32, #tpu.memory_space<vmem>>) attributes {dimension_semantics = [#tpu.dimension_semantics<parallel>], iteration_bounds = array<i64: 2>, scalar_prefetch = 0 : i64, scratch_operands = 2 : i64, tpu.core_type = #tpu.core_type<tc>, window_params = [{transform_indices = @transform_0, window_bounds = array<i64: 1, 2, 2, 8, 32>}, {pipeline_mode = #tpu.pipeline_mode<synchronous>, transform_indices = @transform_1, window_bounds = array<i64: 3, 32, 64>}, {pipeline_mode = #tpu.pipeline_mode<synchronous>, transform_indices = @transform_2, window_bounds = array<i64: 1, 64>}, {pipeline_mode = #tpu.pipeline_mode<synchronous>, transform_indices = @transform_3, window_bounds = array<i64: 3, 64, 64>}, {pipeline_mode = #tpu.pipeline_mode<synchronous>, transform_indices = @transform_4, window_bounds = array<i64: 1, 64>}, {transform_indices = @transform_5, window_bounds = array<i64: 1, 8, 64>}]} {
    %c0 = arith.constant 0 : index
    %c0_0 = arith.constant 0 : index
    %c0_1 = arith.constant 0 : index
    %c0_2 = arith.constant 0 : index
    %c0_3 = arith.constant 0 : index
    %0 = vector.load %arg1[%c0, %c0_0, %c0_1, %c0_2, %c0_3] : memref<1x2x2x8x32xf32, #tpu.memory_space<vmem>>, vector<1x1x1x8x32xf32>
    %1 = vector.shape_cast %0 : vector<1x1x1x8x32xf32> to vector<8x32xf32>
    %c0_4 = arith.constant 0 : index
    %c0_5 = arith.constant 0 : index
    %c1 = arith.constant 1 : index
    %c0_6 = arith.constant 0 : index
    %c0_7 = arith.constant 0 : index
    %2 = vector.load %arg1[%c0_4, %c0_5, %c1, %c0_6, %c0_7] : memref<1x2x2x8x32xf32, #tpu.memory_space<vmem>>, vector<1x1x1x8x32xf32>
    %3 = vector.shape_cast %2 : vector<1x1x1x8x32xf32> to vector<8x32xf32>
    %4 = arith.maximumf %1, %3 : vector<8x32xf32>
    %c0_8 = arith.constant 0 : index
    %c1_9 = arith.constant 1 : index
    %c0_10 = arith.constant 0 : index
    %c0_11 = arith.constant 0 : index
    %c0_12 = arith.constant 0 : index
    %5 = vector.load %arg1[%c0_8, %c1_9, %c0_10, %c0_11, %c0_12] : memref<1x2x2x8x32xf32, #tpu.memory_space<vmem>>, vector<1x1x1x8x32xf32>
    %6 = vector.shape_cast %5 : vector<1x1x1x8x32xf32> to vector<8x32xf32>
    %c0_13 = arith.constant 0 : index
    %c1_14 = arith.constant 1 : index
    %c1_15 = arith.constant 1 : index
    %c0_16 = arith.constant 0 : index
    %c0_17 = arith.constant 0 : index
    %7 = vector.load %arg1[%c0_13, %c1_14, %c1_15, %c0_16, %c0_17] : memref<1x2x2x8x32xf32, #tpu.memory_space<vmem>>, vector<1x1x1x8x32xf32>
    %8 = vector.shape_cast %7 : vector<1x1x1x8x32xf32> to vector<8x32xf32>
    %9 = arith.maximumf %6, %8 : vector<8x32xf32>
    %10 = arith.maximumf %4, %9 : vector<8x32xf32>
    %cst = arith.constant 0.000000e+00 : f32
    %11 = vector.broadcast %cst : f32 to vector<1x32xf32>
    %c0_18 = arith.constant 0 : index
    %c0_19 = arith.constant 0 : index
    %12 = vector.load %arg7[%c0_18, %c0_19] : memref<10x32xf32, #tpu.memory_space<vmem>>, vector<1x32xf32>
    tpu.vector_store %arg7[%c0_18, %c0_19], %11 {strides = array<i32>} : memref<10x32xf32, #tpu.memory_space<vmem>>, vector<1x32xf32>,
    %c9 = arith.constant 9 : index
    %c0_20 = arith.constant 0 : index
    %13 = vector.load %arg7[%c9, %c0_20] : memref<10x32xf32, #tpu.memory_space<vmem>>, vector<1x32xf32>
    tpu.vector_store %arg7[%c9, %c0_20], %11 {strides = array<i32>} : memref<10x32xf32, #tpu.memory_space<vmem>>, vector<1x32xf32>,
    %c1_21 = arith.constant 1 : index
    %c0_22 = arith.constant 0 : index
    %14 = vector.load %arg7[%c1_21, %c0_22] : memref<10x32xf32, #tpu.memory_space<vmem>>, vector<8x32xf32>
    tpu.vector_store %arg7[%c1_21, %c0_22], %10 {strides = array<i32>} : memref<10x32xf32, #tpu.memory_space<vmem>>, vector<8x32xf32>,
    %cst_23 = arith.constant 0.000000e+00 : f32
    %15 = vector.broadcast %cst_23 : f32 to vector<8x64xf32>
    %c0_24 = arith.constant 0 : index
    %c0_25 = arith.constant 0 : index
    %16 = vector.load %arg7[%c0_24, %c0_25] : memref<10x32xf32, #tpu.memory_space<vmem>>, vector<8x32xf32>
    %c0_26 = arith.constant 0 : index
    %c0_27 = arith.constant 0 : index
    %c0_28 = arith.constant 0 : index
    %17 = vector.load %arg2[%c0_26, %c0_27, %c0_28] : memref<3x32x64xf32, #tpu.memory_space<vmem>>, vector<1x32x64xf32>
    %18 = vector.shape_cast %17 : vector<1x32x64xf32> to vector<32x64xf32>
    %cst_29 = arith.constant dense<0.000000e+00> : vector<8x64xf32>
    %19 = tpu.matmul %16, %18, %cst_29 {dimension_numbers = #tpu.dot_dimension_numbers<[1], [0], [0], [1], [0, 0, 1, 1], [], []>} : vector<8x32xf32>, vector<32x64xf32>, vector<8x64xf32> -> vector<8x64xf32>
    %20 = arith.addf %15, %19 : vector<8x64xf32>
    %c1_30 = arith.constant 1 : index
    %c0_31 = arith.constant 0 : index
    %21 = vector.load %arg7[%c1_30, %c0_31] : memref<10x32xf32, #tpu.memory_space<vmem>>, vector<8x32xf32>
    %c1_32 = arith.constant 1 : index
    %c0_33 = arith.constant 0 : index
    %c0_34 = arith.constant 0 : index
    %22 = vector.load %arg2[%c1_32, %c0_33, %c0_34] : memref<3x32x64xf32, #tpu.memory_space<vmem>>, vector<1x32x64xf32>
    %23 = vector.shape_cast %22 : vector<1x32x64xf32> to vector<32x64xf32>
    %cst_35 = arith.constant dense<0.000000e+00> : vector<8x64xf32>
    %24 = tpu.matmul %21, %23, %cst_35 {dimension_numbers = #tpu.dot_dimension_numbers<[1], [0], [0], [1], [0, 0, 1, 1], [], []>} : vector<8x32xf32>, vector<32x64xf32>, vector<8x64xf32> -> vector<8x64xf32>
    %25 = arith.addf %20, %24 : vector<8x64xf32>
    %c2 = arith.constant 2 : index
    %c0_36 = arith.constant 0 : index
    %26 = vector.load %arg7[%c2, %c0_36] : memref<10x32xf32, #tpu.memory_space<vmem>>, vector<8x32xf32>
    %c2_37 = arith.constant 2 : index
    %c0_38 = arith.constant 0 : index
    %c0_39 = arith.constant 0 : index
    %27 = vector.load %arg2[%c2_37, %c0_38, %c0_39] : memref<3x32x64xf32, #tpu.memory_space<vmem>>, vector<1x32x64xf32>
    %28 = vector.shape_cast %27 : vector<1x32x64xf32> to vector<32x64xf32>
    %cst_40 = arith.constant dense<0.000000e+00> : vector<8x64xf32>
    %29 = tpu.matmul %26, %28, %cst_40 {dimension_numbers = #tpu.dot_dimension_numbers<[1], [0], [0], [1], [0, 0, 1, 1], [], []>} : vector<8x32xf32>, vector<32x64xf32>, vector<8x64xf32> -> vector<8x64xf32>
    %30 = arith.addf %25, %29 : vector<8x64xf32>
    %c0_41 = arith.constant 0 : index
    %c0_42 = arith.constant 0 : index
    %31 = vector.load %arg3[%c0_41, %c0_42] : memref<1x64xf32, #tpu.memory_space<vmem>>, vector<1x64xf32>
    %32 = vector.broadcast %31 : vector<1x64xf32> to vector<8x64xf32>
    %33 = arith.addf %30, %32 : vector<8x64xf32>
    %cst_43 = arith.constant 2.000000e-01 : f32
    %34 = vector.broadcast %cst_43 : f32 to vector<8x64xf32>
    %35 = arith.mulf %34, %33 : vector<8x64xf32>
    %36 = arith.maximumf %33, %35 : vector<8x64xf32>
    %cst_44 = arith.constant 0.000000e+00 : f32
    %37 = vector.broadcast %cst_44 : f32 to vector<1x64xf32>
    %c0_45 = arith.constant 0 : index
    %c0_46 = arith.constant 0 : index
    %38 = vector.load %arg8[%c0_45, %c0_46] : memref<10x64xf32, #tpu.memory_space<vmem>>, vector<1x64xf32>
    tpu.vector_store %arg8[%c0_45, %c0_46], %37 {strides = array<i32>} : memref<10x64xf32, #tpu.memory_space<vmem>>, vector<1x64xf32>,
    %c9_47 = arith.constant 9 : index
    %c0_48 = arith.constant 0 : index
    %39 = vector.load %arg8[%c9_47, %c0_48] : memref<10x64xf32, #tpu.memory_space<vmem>>, vector<1x64xf32>
    tpu.vector_store %arg8[%c9_47, %c0_48], %37 {strides = array<i32>} : memref<10x64xf32, #tpu.memory_space<vmem>>, vector<1x64xf32>,
    %c1_49 = arith.constant 1 : index
    %c0_50 = arith.constant 0 : index
    %40 = vector.load %arg8[%c1_49, %c0_50] : memref<10x64xf32, #tpu.memory_space<vmem>>, vector<8x64xf32>
    tpu.vector_store %arg8[%c1_49, %c0_50], %36 {strides = array<i32>} : memref<10x64xf32, #tpu.memory_space<vmem>>, vector<8x64xf32>,
    %cst_51 = arith.constant 0.000000e+00 : f32
    %41 = vector.broadcast %cst_51 : f32 to vector<8x64xf32>
    %c0_52 = arith.constant 0 : index
    %c0_53 = arith.constant 0 : index
    %42 = vector.load %arg8[%c0_52, %c0_53] : memref<10x64xf32, #tpu.memory_space<vmem>>, vector<8x64xf32>
    %c0_54 = arith.constant 0 : index
    %c0_55 = arith.constant 0 : index
    %c0_56 = arith.constant 0 : index
    %43 = vector.load %arg4[%c0_54, %c0_55, %c0_56] : memref<3x64x64xf32, #tpu.memory_space<vmem>>, vector<1x64x64xf32>
    %44 = vector.shape_cast %43 : vector<1x64x64xf32> to vector<64x64xf32>
    %cst_57 = arith.constant dense<0.000000e+00> : vector<8x64xf32>
    %45 = tpu.matmul %42, %44, %cst_57 {dimension_numbers = #tpu.dot_dimension_numbers<[1], [0], [0], [1], [0, 0, 1, 1], [], []>} : vector<8x64xf32>, vector<64x64xf32>, vector<8x64xf32> -> vector<8x64xf32>
    %46 = arith.addf %41, %45 : vector<8x64xf32>
    %c1_58 = arith.constant 1 : index
    %c0_59 = arith.constant 0 : index
    %47 = vector.load %arg8[%c1_58, %c0_59] : memref<10x64xf32, #tpu.memory_space<vmem>>, vector<8x64xf32>
    %c1_60 = arith.constant 1 : index
    %c0_61 = arith.constant 0 : index
    %c0_62 = arith.constant 0 : index
    %48 = vector.load %arg4[%c1_60, %c0_61, %c0_62] : memref<3x64x64xf32, #tpu.memory_space<vmem>>, vector<1x64x64xf32>
    %49 = vector.shape_cast %48 : vector<1x64x64xf32> to vector<64x64xf32>
    %cst_63 = arith.constant dense<0.000000e+00> : vector<8x64xf32>
    %50 = tpu.matmul %47, %49, %cst_63 {dimension_numbers = #tpu.dot_dimension_numbers<[1], [0], [0], [1], [0, 0, 1, 1], [], []>} : vector<8x64xf32>, vector<64x64xf32>, vector<8x64xf32> -> vector<8x64xf32>
    %51 = arith.addf %46, %50 : vector<8x64xf32>
    %c2_64 = arith.constant 2 : index
    %c0_65 = arith.constant 0 : index
    %52 = vector.load %arg8[%c2_64, %c0_65] : memref<10x64xf32, #tpu.memory_space<vmem>>, vector<8x64xf32>
    %c2_66 = arith.constant 2 : index
    %c0_67 = arith.constant 0 : index
    %c0_68 = arith.constant 0 : index
    %53 = vector.load %arg4[%c2_66, %c0_67, %c0_68] : memref<3x64x64xf32, #tpu.memory_space<vmem>>, vector<1x64x64xf32>
    %54 = vector.shape_cast %53 : vector<1x64x64xf32> to vector<64x64xf32>
    %cst_69 = arith.constant dense<0.000000e+00> : vector<8x64xf32>
    %55 = tpu.matmul %52, %54, %cst_69 {dimension_numbers = #tpu.dot_dimension_numbers<[1], [0], [0], [1], [0, 0, 1, 1], [], []>} : vector<8x64xf32>, vector<64x64xf32>, vector<8x64xf32> -> vector<8x64xf32>
    %56 = arith.addf %51, %55 : vector<8x64xf32>
    %c0_70 = arith.constant 0 : index
    %c0_71 = arith.constant 0 : index
    %57 = vector.load %arg5[%c0_70, %c0_71] : memref<1x64xf32, #tpu.memory_space<vmem>>, vector<1x64xf32>
    %58 = vector.broadcast %57 : vector<1x64xf32> to vector<8x64xf32>
    %59 = arith.addf %56, %58 : vector<8x64xf32>
    %cst_72 = arith.constant 2.000000e-01 : f32
    %60 = vector.broadcast %cst_72 : f32 to vector<8x64xf32>
    %61 = arith.mulf %60, %59 : vector<8x64xf32>
    %62 = arith.maximumf %59, %61 : vector<8x64xf32>
    %c0_73 = arith.constant 0 : index
    %c0_74 = arith.constant 0 : index
    %c0_75 = arith.constant 0 : index
    %63 = vector.load %arg6[%c0_73, %c0_74, %c0_75] : memref<1x8x64xf32, #tpu.memory_space<vmem>>, vector<1x8x64xf32>
    %64 = vector.shape_cast %63 : vector<1x8x64xf32> to vector<8x64xf32>
    %65 = vector.shape_cast %62 : vector<8x64xf32> to vector<1x8x64xf32>
    tpu.vector_store %arg6[%c0_73, %c0_74, %c0_75], %65 {strides = array<i32>} : memref<1x8x64xf32, #tpu.memory_space<vmem>>, vector<1x8x64xf32>,
    return
  }
  func.func @transform_0(%arg0: i32) -> (i32, i32, i32, i32, i32) {
    %c0_i32 = arith.constant 0 : i32
    %c0_i32_0 = arith.constant 0 : i32
    %c0_i32_1 = arith.constant 0 : i32
    %c0_i32_2 = arith.constant 0 : i32
    %c0_i32_3 = arith.constant 0 : i32
    return %arg0, %c0_i32, %c0_i32_0, %c0_i32_1, %c0_i32_2 : i32, i32, i32, i32, i32
  }
  func.func @transform_1(%arg0: i32) -> (i32, i32, i32) {
    %c0_i32 = arith.constant 0 : i32
    %c0_i32_0 = arith.constant 0 : i32
    %c0_i32_1 = arith.constant 0 : i32
    %c0_i32_2 = arith.constant 0 : i32
    return %c0_i32, %c0_i32_0, %c0_i32_1 : i32, i32, i32
  }
  func.func @transform_2(%arg0: i32) -> (i32, i32) {
    %c0_i32 = arith.constant 0 : i32
    %c0_i32_0 = arith.constant 0 : i32
    %c0_i32_1 = arith.constant 0 : i32
    return %c0_i32, %c0_i32_0 : i32, i32
  }
  func.func @transform_3(%arg0: i32) -> (i32, i32, i32) {
    %c0_i32 = arith.constant 0 : i32
    %c0_i32_0 = arith.constant 0 : i32
    %c0_i32_1 = arith.constant 0 : i32
    %c0_i32_2 = arith.constant 0 : i32
    return %c0_i32, %c0_i32_0, %c0_i32_1 : i32, i32, i32
  }
  func.func @transform_4(%arg0: i32) -> (i32, i32) {
    %c0_i32 = arith.constant 0 : i32
    %c0_i32_0 = arith.constant 0 : i32
    %c0_i32_1 = arith.constant 0 : i32
    return %c0_i32, %c0_i32_0 : i32, i32
  }
  func.func @transform_5(%arg0: i32) -> (i32, i32, i32) {
    %c0_i32 = arith.constant 0 : i32
    %c0_i32_0 = arith.constant 0 : i32
    %c0_i32_1 = arith.constant 0 : i32
    return %arg0, %c0_i32, %c0_i32_0 : i32, i32, i32
  }
}

</mosaic_0001>

<bundles_post_ra>
// kernel: tile.13
= control target key start
LH: loop header
LB: loop body
LE: loop exit
PB: predicated region body
PF: predicated region fallthrough
CT: control target
= control target key end

     0   :  { %s22_s0 = inlined_call_operand.vmem [shape: f32[8], index: 0, kind: input, shape index: {}]   ;;  %s23_s1 = inlined_call_operand.vmem [shape: f32[8,8], index: 1, kind: output, shape index: {}]  }
   0x1   :  { %v4_v0 = vld [vmem:[%s22_s0] ss:$0 sm:$0xff] }
   0x2   :  { %5 = vst [vmem:[%s23_s1] sm:$0xff] %v4_v0 }

// kernel: tile.14
= control target key start
LH: loop header
LB: loop body
LE: loop exit
PB: predicated region body
PF: predicated region fallthrough
CT: control target
= control target key end

     0   :  { %s67_s10 = smov 56   ;;  %s68_s11 = smov 40   ;;  %vm3_vm0 = vcmask 64512   ;;  %vm9_vm1 = vcmask 523712   ;;  %vm15_vm2 = vcmask 458112   ;;  %vm21_vm3 = vcmask 392512   ;;  %s111_s0 = inlined_call_operand.vmem [shape: f32[8,8], index: 0, kind: input, shape index: {}]   ;;  %s112_s1 = inlined_call_operand.vmem [shape: f32[1,64], index: 1, kind: output, shape index: {}]  }
   0x1   :  { %v53_v0 = vld [vmem:[%s111_s0 + $0x7] sm:$0x1]   ;;  %v55_v1 = vld [vmem:[%s111_s0 + $0x5] sm:$0x1]   ;;  %v54_v2 = vld [vmem:[%s111_s0 + $0x6] sm:$0x1]  }
   0x2   :  { %7 = vrot.lane.b32.xlu0 %v53_v0, %s67_s10  ;;  %19 = vrot.lane.b32.xlu1 %v55_v1, %s68_s11  ;;  %v56_v3 = vld [vmem:[%s111_s0 + $0x4] sm:$0x1]   ;;  %v2_v4 = vld [vmem:[%s111_s0] sm:$0x1]   ;;  %s69_s18 = smov 48   ;;  %s70_s19 = smov 32  }
   0x3   :  { %4 = vst.msk [vmem:[#allocation0] sm:$0x1] %vm3_vm0, %v2_v4   ;;  %v57_v5 = vld [vmem:[%s111_s0 + $0x3] sm:$0x1]   ;;  %v58_v6 = vld [vmem:[%s111_s0 + $0x2] sm:$0x1]  }
   0x4   :  { %s71_s24 = smov 24   ;;  %s72_s25 = smov 16   ;;  %v59_v7 = vld [vmem:[%s111_s0 + $0x1] sm:$0x1]   ;;  %vm27_vm4 = vcmask 326912   ;;  %vm33_vm5 = vcmask 261312  }
   0x5   :  { %s73_s0 = smov 8   ;;  %vm39_vm6 = vcmask 195712   ;;  %vm45_vm7 = vcmask 130112  }
   0x6   :  { %13 = vrot.lane.b32.xlu0 %v54_v2, %s69_s18  ;;  %25 = vrot.lane.b32.xlu1 %v56_v3, %s70_s19 }
   0xa   :  { %31 = vrot.lane.b32.xlu0 %v57_v5, %s71_s24  ;;  %37 = vrot.lane.b32.xlu1 %v58_v6, %s72_s25 }
   0xe   :  { %43 = vrot.lane.b32.xlu0 %v59_v7, %s73_s0 }
  0x74   :  { %v8_v8 = vpop.permute.xlu0 %7   ;;  %v20_v9 = vpop.permute.xlu1 %19  }
  0x75   :  { %10 = vst.msk [vmem:[#allocation0] sm:$0x1] %vm9_vm1, %v8_v8  }
  0x78   :  { %v14_v10 = vpop.permute.xlu0 %13   ;;  %v26_v11 = vpop.permute.xlu1 %25  }
  0x79   :  { %16 = vst.msk [vmem:[#allocation0] sm:$0x1] %vm15_vm2, %v14_v10  }
  0x7a   :  { %22 = vst.msk [vmem:[#allocation0] sm:$0x1] %vm21_vm3, %v20_v9  }
  0x7b   :  { %28 = vst.msk [vmem:[#allocation0] sm:$0x1] %vm27_vm4, %v26_v11  }
  0x7c   :  { %v32_v12 = vpop.permute.xlu0 %31   ;;  %v38_v13 = vpop.permute.xlu1 %37  }
  0x7d   :  { %34 = vst.msk [vmem:[#allocation0] sm:$0x1] %vm33_vm5, %v32_v12  }
  0x7e   :  { %40 = vst.msk [vmem:[#allocation0] sm:$0x1] %vm39_vm6, %v38_v13  }
  0x80   :  { %v44_v14 = vpop.permute.xlu0 %43  }
  0x81   :  { %46 = vst.msk [vmem:[#allocation0] sm:$0x1] %vm45_vm7, %v44_v14  }
  0x88   :  { %v50_v15 = vld [vmem:[#allocation0] sm:$0x1] }
  0x89   :  { %52 = vst [vmem:[%s112_s1] sm:$0x1] %v50_v15 }

// kernel: down_pallas.1
= control target key start
LH: loop header
LB: loop body
LE: loop exit
PB: predicated region body
PF: predicated region fallthrough
CT: control target
= control target key end

     0   :  { %s1087_s18 = smov 0   ;;  %s1265_s0 = inlined_call_operand.vmem [shape: f32[2,2,2,8,32], index: 0, kind: input, shape index: {}]   ;;  %s1266_s1 = inlined_call_operand.vmem [shape: f32[3,32,64], index: 1, kind: input, shape index: {}]   ;;  %s1267_s2 = inlined_call_operand.vmem [shape: f32[1,64], index: 2, kind: input, shape index: {}]   ;;  %s1268_s3 = inlined_call_operand.vmem [shape: f32[3,64,64], index: 3, kind: input, shape index: {}]   ;;  %s1269_s4 = inlined_call_operand.vmem [shape: f32[1,64], index: 4, kind: input, shape index: {}]   ;;  %s1270_s5 = inlined_call_operand.vmem [shape: f32[2,8,64], index: 5, kind: output, shape index: {}]  }
   0x1 LB: > { %s803_s19 = sadd.s32 4294967295, %s1052_s18   ;;  %p807_p0 = scmp.ge.s32.totalorder %s1052_s18, 1  ;;  %s1052_s18 = sphi %s1087_s18, %s15_s18  }
   0x2   : > { %p187_p1 = scmp.lt.s32.totalorder %s1052_s18, 3 }
   0x4   : > { %p188_p2 = pnand %p807_p0, %p187_p1 }
   0x5   : > { %v814_v0 = vld [vmem:[%s1266_s1 + $0x20] sm:$0xff] (!%p188_p2)  ;;  %v815_v1 = vld [vmem:[%s1266_s1 + $0x28] sm:$0xff] (!%p188_p2)  ;;  %v1054_v3 = vmov (!%p188_p2), 0.0|0.0   ;;  %v816_v6 = vld [vmem:[%s1266_s1 + $0x30] sm:$0xff] (!%p188_p2)  ;;  %p214_p3 = scmp.lt.s32.totalorder (!%p188_p2), %s803_s19, 1  ;;  %vm233_vm0 = vcmask (!%p188_p2), 253952  }
   0x6   : > { %191 = sbr.rel (%p188_p2) target bundleno = 503 (0x1f7), region = 40  ;;  %v239_v2 = vld [vmem:[%s1266_s1] sm:$0xff] (!%p188_p2)  ;;  %981 = vmatprep.subr.bf16.mxu0 (!%p188_p2), %v1054_v3  ;;  %v982_v4 = vpack.c.bf16 (!%p188_p2), %v815_v1, %v814_v0  ;;  %987 = vmatprep.subr.bf16.mxu1 (!%p188_p2), %v1054_v3  ;;  %v240_v5 = vld [vmem:[%s1266_s1 + $0x8] sm:$0xff] (!%p188_p2)  ;;  %v817_v7 = vld [vmem:[%s1266_s1 + $0x38] sm:$0xff] (!%p188_p2)  ;;  %vm1055_vm1 = vmmov (!%p188_p2), 0   ;;  %v1056_v11 = vmov (!%p188_p2), 0.0  }
   0x7   : > { %v988_v8 = vpack.c.bf16 (!%p188_p2), %v240_v5, %v239_v2  ;;  %v241_v9 = vld [vmem:[%s1266_s1 + $0x10] sm:$0xff] (!%p188_p2)  ;;  %v242_v10 = vld [vmem:[%s1266_s1 + $0x18] sm:$0xff] (!%p188_p2)  ;;  %899 = vmatprep.mubr.msk.f32.mxu0 (!%p188_p2), %vm1055_vm1, %v1056_v11  ;;  %910 = vmatprep.mubr.msk.f32.mxu1 (!%p188_p2), %vm1055_vm1, %v1056_v11  ;;  %234 = vst.msk [vmem:[#allocation2] sm:$0x1] (!%p188_p2), %vm233_vm0, %v1056_v11  ;;  %235 = vst.msk [vmem:[#allocation2 + $0x9] sm:$0x1] (!%p188_p2), %vm233_vm0, %v1056_v11  ;;  %v985_v12 = vpack.c.bf16 (!%p188_p2), %v817_v7, %v816_v6 }
   0x8   : > { %983 = vmatpush3.bf16.msra.mxu0 (!%p188_p2), %v982_v4  ;;  %v991_v13 = vpack.c.bf16 (!%p188_p2), %v242_v10, %v241_v9  ;;  %vm236_vm2 = vcmask (!%p188_p2), 261120   ;;  %v820_v21 = vld [vmem:[%s1266_s1 + $0x40] sm:$0xff] (!%p188_p2)  ;;  %v821_v22 = vld [vmem:[%s1266_s1 + $0x48] sm:$0xff] (!%p188_p2)  ;;  %v822_v24 = vld [vmem:[%s1266_s1 + $0x50] sm:$0xff] (!%p188_p2)  ;;  %vm485_vm3 = vcmask (!%p188_p2), 516096   ;;  %vm488_vm4 = vcmask (!%p188_p2), 523264  }
   0x9   : > { %989 = vmatpush3.bf16.msra.mxu1 (!%p188_p2), %v988_v8  ;;  %984 = vmatprep.subr.bf16.mxu0 (!%p188_p2), %v1054_v3  ;;  %v994_v23 = vpack.c.bf16 (!%p188_p2), %v821_v22, %v820_v21  ;;  %v823_v25 = vld [vmem:[%s1266_s1 + $0x58] sm:$0xff] (!%p188_p2)  ;;  %v826_v30 = vld [vmem:[%s1268_s3 + $0x40] sm:$0xff] (!%p188_p2)  ;;  %v827_v31 = vld [vmem:[%s1268_s3 + $0x48] sm:$0xff] (!%p188_p2)  ;;  %486 = vst.msk [vmem:[#allocation3] sm:$0x1] (!%p188_p2), %vm485_vm3, %v1056_v11 }
   0xa   : > { %990 = vmatprep.subr.bf16.mxu1 (!%p188_p2), %v1054_v3  ;;  %v997_v28 = vpack.c.bf16 (!%p188_p2), %v823_v25, %v822_v24  ;;  %v1000_v32 = vpack.c.bf16 (!%p188_p2), %v827_v31, %v826_v30  ;;  %v491_v33 = vld [vmem:[%s1268_s3] sm:$0xff] (!%p188_p2)  ;;  %v492_v34 = vld [vmem:[%s1268_s3 + $0x8] sm:$0xff] (!%p188_p2)  ;;  %v828_v36 = vld [vmem:[%s1268_s3 + $0x50] sm:$0xff] (!%p188_p2)  ;;  %487 = vst.msk [vmem:[#allocation3 + $0x9] sm:$0x1] (!%p188_p2), %vm485_vm3, %v1056_v11 }
   0xb   : > { %v1012_v35 = vpack.c.bf16 (!%p188_p2), %v492_v34, %v491_v33  ;;  %v829_v37 = vld [vmem:[%s1268_s3 + $0x58] sm:$0xff] (!%p188_p2)  ;;  %v493_v39 = vld [vmem:[%s1268_s3 + $0x10] sm:$0xff] (!%p188_p2)  ;;  %v830_v42 = vld [vmem:[%s1268_s3 + $0x60] sm:$0xff] (!%p188_p2) }
   0xc   : > { %986 = vmatpush3.bf16.msra.mxu0 (!%p188_p2), %v985_v12  ;;  %v1003_v38 = vpack.c.bf16 (!%p188_p2), %v829_v37, %v828_v36  ;;  %v494_v40 = vld [vmem:[%s1268_s3 + $0x18] sm:$0xff] (!%p188_p2)  ;;  %v831_v43 = vld [vmem:[%s1268_s3 + $0x68] sm:$0xff] (!%p188_p2)  ;;  %v495_v45 = vld [vmem:[%s1268_s3 + $0x20] sm:$0xff] (!%p188_p2) }
   0xd   : > { %s1272_s19 = smov (!%p214_p3, %s803_s19), 1  ;;  %992 = vmatpush3.bf16.msra.mxu1 %v991_v13  ;;  %993 = vmatprep.subr.bf16.mxu0 %v1054_v3  ;;  %v1015_v41 = vpack.c.bf16 %v494_v40, %v493_v39  ;;  %v1006_v44 = vpack.c.bf16 %v831_v43, %v830_v42  ;;  %v496_v46 = vld [vmem:[%s1268_s3 + $0x28] sm:$0xff]  ;;  %v832_v47 = vld [vmem:[%s1268_s3 + $0x70] sm:$0xff]  ;;  %v833_v49 = vld [vmem:[%s1268_s3 + $0x78] sm:$0xff] }
   0xe   : > { %s848_s11 = sshll.u32 %s1272_s19, 5  ;;  %999 = vmatprep.subr.bf16.mxu1 %v1054_v3  ;;  %v1018_v48 = vpack.c.bf16 %v496_v46, %v495_v45  ;;  %v497_v50 = vld [vmem:[%s1268_s3 + $0x30] sm:$0xff]  ;;  %v498_v51 = vld [vmem:[%s1268_s3 + $0x38] sm:$0xff]  ;;  %v1009_v52 = vpack.c.bf16 %v833_v49, %v832_v47  ;;  %v825_v60 = vld [vmem:[%s1267_s2] ss:$0 sm:$0xff]  ;;  %s810_s6 = sshll.u32 %s1272_s19, 3 }
   0xf   : > { %s218_s14 = scalar_lea.vmem %s1265_s0, %s848_s11  ;;  %v1021_v53 = vpack.c.bf16 %v498_v51, %v497_v50  ;;  %v836_v2 = vld [vmem:[%s1268_s3 + $0x80] sm:$0xff]  ;;  %v837_v4 = vld [vmem:[%s1268_s3 + $0x88] sm:$0xff]  ;;  %v838_v6 = vld [vmem:[%s1268_s3 + $0x90] sm:$0xff]  ;;  %s222_s9 = scalar_lea.vmem %s1270_s5, %s810_s6 }
  0x10   : > { %v223_v14 = vld [vmem:[%s218_s14] sm:$0xff]  ;;  %v811_v15 = vld [vmem:[%s218_s14 + $0x8] sm:$0xff]  ;;  %v812_v16 = vld [vmem:[%s218_s14 + $0x10] sm:$0xff]  ;;  %v1024_v5 = vpack.c.bf16 %v837_v4, %v836_v2 }
  0x11   : > { %v226_v17 = vmax.f32 %v223_v14, %v811_v15  ;;  %v813_v18 = vld [vmem:[%s218_s14 + $0x18] sm:$0xff]  ;;  %v840_v12 = vld [vmem:[%s1268_s3 + $0xa0] sm:$0xff]  ;;  %v841_v13 = vld [vmem:[%s1268_s3 + $0xa8] sm:$0xff] }
  0x12   : > { %v231_v19 = vmax.f32 %v812_v16, %v813_v18  ;;  %v839_v7 = vld [vmem:[%s1268_s3 + $0x98] sm:$0xff]  ;;  %v1030_v14 = vpack.c.bf16 %v841_v13, %v840_v12  ;;  %v842_v15 = vld [vmem:[%s1268_s3 + $0xb0] sm:$0xff]  ;;  %v845_v24 = vld [vmem:[%s1269_s4] ss:$0 sm:$0xff] }
  0x13   : > { %v1027_v10 = vpack.c.bf16 %v839_v7, %v838_v6 }
  0x14   : > { %v232_v20 = vmax.f32 %v226_v17, %v231_v19 }
  0x16   : > { %237 = vst.msk [vmem:[#allocation2 + $0x1] sm:$0xff] %vm236_vm2, %v232_v20 }
  0x1d   : > { %v243_v26 = vld [vmem:[#allocation2 + $0x1] sm:$0xff] }
  0x1e   : > { %v238_v27 = vld [vmem:[#allocation2] sm:$0xff]  ;;  %900 = vmatmul.mubr.msk.f32.vlgmr.msra.gmra.mrb[0].mxu0 %vm236_vm2, %v243_v26 }
  0x1f   : > { %911 = vmatmul.mubr.msk.f32.vlgmr.msra.gmra.mrb[0].mxu1 %vm236_vm2, %v238_v27  ;;  %995 = vmatpush3.bf16.msra.mxu0 %v994_v23  ;;  %v395_v29 = vld [vmem:[#allocation2 + $0x2] sm:$0xff] }
  0x20   : > { %921 = vmatprep.mubr.msk.f32.mxu0 %vm1055_vm1, %v1056_v11  ;;  %996 = vmatprep.subr.bf16.mxu0 %v1054_v3 }
  0x21   : > { %940 = vmatprep.mubr.msk.f32.mxu1 %vm1055_vm1, %v1056_v11  ;;  %1001 = vmatpush3.bf16.msra.mxu1 %v1000_v32 }
  0x22   : > { %1002 = vmatprep.subr.bf16.mxu1 %v1054_v3 }
  0x23   : > { %998 = vmatpush3.bf16.msra.mxu0 %v997_v28 }
  0x24   : > { %1011 = vmatprep.subr.bf16.mxu0 %v1054_v3 }
  0x25   : > { %1004 = vmatpush3.bf16.msra.mxu1 %v1003_v38 }
  0x26   : > { %922 = vmatmul.mubr.msk.f32.vlgmr.msra.gmra.mrb[2].mxu0 %vm236_vm2, %v395_v29  ;;  %1005 = vmatprep.subr.bf16.mxu1 %v1054_v3 }
  0x27   : > { %959 = vmatprep.mubr.msk.f32.mxu0 %vm1055_vm1, %v1056_v11  ;;  %1013 = vmatpush3.bf16.msra.mxu0 %v1012_v35 }
  0x28   : > { %1014 = vmatprep.subr.bf16.mxu0 %v1054_v3 }
  0x29   : > { %1007 = vmatpush3.bf16.msra.mxu1 %v1006_v44 }
  0x2a   : > { %1008 = vmatprep.subr.bf16.mxu1 %v1054_v3 }
  0x2b   : > { %1016 = vmatpush3.bf16.msra.mxu0 %v1015_v41 }
  0x2c   : > { %1017 = vmatprep.subr.bf16.mxu0 %v1054_v3 }
  0x2d   : > { %1010 = vmatpush3.bf16.msra.mxu1 %v1009_v52 }
  0x2e   : > { %1023 = vmatprep.subr.bf16.mxu1 %v1054_v3 }
  0x2f   : > { %1019 = vmatpush3.bf16.msra.mxu0 %v1018_v48 }
  0x30   : > { %1020 = vmatprep.subr.bf16.mxu0 %v1054_v3 }
  0x33   : > { %1022 = vmatpush3.bf16.msra.mxu0 %v1021_v53 }
  0xf1   : > { %v318_v54 = vpop.f32.mrb[0].mxu0 }
  0xf2   : > { %v391_v55 = vpop.f32.mrb[0].mxu1  ;;  %v901_v57 = vpop.f32.mrb[1].mxu0 }
  0xf3   : > { %v392_v56 = vadd.f32 %v391_v55, %v318_v54  ;;  %v912_v58 = vpop.f32.mrb[1].mxu1 }
  0xf9   : > { %v470_v59 = vpop.f32.mrb[2].mxu0 }
  0xfa   : > { %v474_v61 = vadd.f32 %v470_v59, %v392_v56  ;;  %v923_v62 = vpop.f32.mrb[3].mxu0 }
  0xfc   : > { %v482_v63 = vadd.f32 %v825_v60, %v474_v61 }
  0xfe   : > { %v483_v0 = vmul.f32 0.2, %v482_v63 }
 0x100   : > { %v484_v1 = vmax.f32 %v482_v63, %v483_v0 }
 0x102   : > { %489 = vst.msk [vmem:[#allocation3 + $0x1] sm:$0xff] %vm488_vm4, %v484_v1 }
 0x109   : > { %v499_v8 = vld [vmem:[#allocation3 + $0x1] sm:$0xff] }
 0x10a   : > { %v490_v9 = vld [vmem:[#allocation3] sm:$0xff]  ;;  %941 = vmatmul.mubr.msk.f32.vlgmr.msra.gmra.mrb[2].mxu1 %vm488_vm4, %v499_v8 }
 0x10b   : > { %960 = vmatmul.mubr.msk.f32.vlgmr.msra.gmra.mrb[4].mxu0 %vm488_vm4, %v490_v9  ;;  %1025 = vmatpush3.bf16.msra.mxu1 %v1024_v5  ;;  %v655_v17 = vld [vmem:[#allocation3 + $0x2] sm:$0xff] }
 0x10c   : > { %978 = vmatprep.mubr.msk.f32.mxu1 %vm1055_vm1, %v1056_v11  ;;  %1026 = vmatprep.subr.bf16.mxu1 %v1054_v3  ;;  %v843_v11 = vld [vmem:[%s1268_s3 + $0xb8] sm:$0xff] }
 0x10d   : > { %v1033_v16 = vpack.c.bf16 %v843_v11, %v842_v15 }
 0x10f   : > { %1028 = vmatpush3.bf16.msra.mxu1 %v1027_v10 }
 0x110   : > { %1029 = vmatprep.subr.bf16.mxu1 %v1054_v3 }
 0x113   : > { %1031 = vmatpush3.bf16.msra.mxu1 %v1030_v14 }
 0x114   : > { %1032 = vmatprep.subr.bf16.mxu1 %v1054_v3 }
 0x117   : > { %1034 = vmatpush3.bf16.msra.mxu1 %v1033_v16 }
 0x11a   : > { %979 = vmatmul.mubr.msk.f32.vlgmr.msra.gmra.mrb[4].mxu1 %vm488_vm4, %v655_v17 }
 0x1dd   : > { %v578_v18 = vpop.f32.mrb[2].mxu1 }
 0x1de   : > { %v651_v19 = vpop.f32.mrb[4].mxu0  ;;  %v942_v21 = vpop.f32.mrb[3].mxu1 }
 0x1df   : > { %v652_v20 = vadd.f32 %v651_v19, %v578_v18  ;;  %v961_v22 = vpop.f32.mrb[5].mxu0 }
 0x1ed   : > { %v734_v23 = vpop.f32.mrb[4].mxu1 }
 0x1ee   : > { %v738_v25 = vadd.f32 %v734_v23, %v652_v20  ;;  %v980_v26 = vpop.f32.mrb[5].mxu1 }
 0x1f0   : > { %v746_v27 = vadd.f32 %v845_v24, %v738_v25 }
 0x1f2   : > { %v747_v28 = vmul.f32 0.2, %v746_v27 }
 0x1f4   : > { %v748_v3 = vmax.f32 %v746_v27, %v747_v28 }
 0x1f6   : > { %749 = vst.msk [vmem:[%s222_s9] sm:$0xff] %vm488_vm4, %v748_v3 }
 0x1f7 PF: > { %s15_s18 = sadd.s32 1, %s1052_s18  }
 0x1f8   : > { %p12_p4 = scmp.ge.s32.totalorder %s15_s18, 4  }
 0x1fa   :  { %14 = sbr.rel (!%p12_p4) target bundleno = 1 (0x1), region = 77 }

</bundles_post_ra>
